<compile_context>
chip_gen: v5e
topology: v5e:2x2
jax: 0.10.0
libtpu: 0.0.40
codegen_flags: <defaults>
</compile_context>

<pallas_src>
import jax
import jax.numpy as jnp
from jax.experimental import pallas as pl
from jax.experimental.pallas import tpu as pltpu


_LANE_W = 512          # lane-dense width, multiple of 128 -> unmasked full-width vst
_TILE_M_MAX = 2048     # 2048 * 512 * 4 B = 4 MiB per f32 tile
_ROW_Q = 16            # row quantum: multiple of 16 satisfies f32 (8) and bf16 (16) sublane tiling
_MIN_GRID_STEPS = 4    # aim for >= 4 steps so DMA/compute overlap and both v7x TCs get work


def _h_swish_kernel(x_ref, o_ref):
    x = x_ref[...]
    # h_swish(x) = x * relu6(x + 3) / 6 == x * clamp(x + 3, 0, 6) * (1/6)
    # Weak-typed constants keep the compute in the input's native dtype.
    y = x * (jnp.clip(x + 3.0, 0.0, 6.0) * (1.0 / 6.0))
    o_ref[...] = y.astype(o_ref.dtype)


def _h_swish_jnp(x):
    return x * (jnp.clip(x + 3.0, 0.0, 6.0) * (1.0 / 6.0))


def h_swish(x):
    """Elementwise h_swish on an arbitrary-shape tensor via a Pallas TPU kernel."""
    orig_shape = x.shape
    orig_dtype = x.dtype

    flat = x.reshape(-1)
    n = flat.shape[0]

    m = n // _LANE_W
    rem = n - m * _LANE_W

    if m == 0:
        # Tiny tensor (< 512 elements): launch overhead dominates, plain jnp.
        return _h_swish_jnp(flat).astype(orig_dtype).reshape(orig_shape)

    # Lane-aligned prefix goes through the kernel; ragged tail handled below.
    head = flat[: m * _LANE_W].reshape(m, _LANE_W)

    # Row tiling: <= 4 MiB blocks, rows a multiple of the sublane quantum, and
    # at least _MIN_GRID_STEPS grid steps once the tensor is big enough.
    if m <= _ROW_Q:
        tile_m = m  # block == full array dims -> exempt from (8,128)/(16,128) tiling rule
    else:
        tile_m = max(
            _ROW_Q,
            min(_TILE_M_MAX, _ROW_Q * pl.cdiv(m, _ROW_Q * _MIN_GRID_STEPS)),
        )

    grid = (pl.cdiv(m, tile_m),)

    itemsize = jnp.dtype(orig_dtype).itemsize
    n_head = m * _LANE_W
    cost = pl.CostEstimate(
        flops=4 * n_head,
        transcendentals=0,
        bytes_accessed=2 * n_head * itemsize,
    )

    out = pl.pallas_call(
        _h_swish_kernel,
        out_shape=jax.ShapeDtypeStruct((m, _LANE_W), orig_dtype),
        grid_spec=pltpu.PrefetchScalarGridSpec(
            num_scalar_prefetch=0,
            grid=grid,
            in_specs=[pl.BlockSpec((tile_m, _LANE_W), lambda i: (i, 0))],
            out_specs=pl.BlockSpec((tile_m, _LANE_W), lambda i: (i, 0)),
        ),
        compiler_params=pltpu.CompilerParams(
            # Independent tiles -> shardable across TCs on v7x, neutral elsewhere.
            dimension_semantics=("parallel",),
            # Footprint: 2 arrays x 2 buffers x <= 4 MiB tile = <= 16 MiB.
            # 32 MiB clears v5e's 16 MiB scoped default with headroom, without
            # requesting all of v7x's 64 MiB physical VMEM.
            vmem_limit_bytes=32 * 1024 * 1024,
        ),
        cost_estimate=cost,
    )(head)

    out_flat = out.reshape(-1)
    if rem:
        # Ragged tail (< 512 elements) in plain jnp — avoids the pad + slice
        # extra HBM read/write passes around the opaque custom call.
        tail = _h_swish_jnp(flat[m * _LANE_W :]).astype(orig_dtype)
        out_flat = jnp.concatenate([out_flat, tail])

    return out_flat.reshape(orig_shape)


if __name__ == "__main__":
    key = jax.random.PRNGKey(0)
    # NCHW input, consistent with PyTorch conv conventions.
    x = jax.random.normal(key, (2, 4, 16, 16), dtype=jnp.float32) * 4.0

    y = h_swish(x)
    y = jax.block_until_ready(y)

    # Reference check in plain JAX: x * relu6(x + 3) / 6.
    y_ref = x * jnp.clip(x + 3.0, 0.0, 6.0) / 6.0
    assert y.shape == x.shape and y.dtype == x.dtype
    assert jnp.allclose(y, y_ref, atol=1e-5), "mismatch vs reference"

    print("KERNEL_OK")
</pallas_src>

<mosaic_0001>
module attributes {stable_mosaic.version = 11 : i64} {
  func.func @_h_swish_kernel(%arg0: i32, %arg1: memref<4x512xf32, #tpu.memory_space<vmem>>, %arg2: memref<4x512xf32, #tpu.memory_space<vmem>>) attributes {dimension_semantics = [#tpu.dimension_semantics<parallel>], iteration_bounds = array<i64: 1>, scalar_prefetch = 0 : i64, scratch_operands = 0 : i64, tpu.core_type = #tpu.core_type<tc>, window_params = [{transform_indices = @transform_0, window_bounds = array<i64: 4, 512>}, {transform_indices = @transform_1, window_bounds = array<i64: 4, 512>}]} {
    %c0 = arith.constant 0 : index
    %c0_0 = arith.constant 0 : index
    %0 = vector.load %arg1[%c0, %c0_0] : memref<4x512xf32, #tpu.memory_space<vmem>>, vector<4x512xf32>
    %cst = arith.constant 3.000000e+00 : f32
    %1 = vector.broadcast %cst : f32 to vector<4x512xf32>
    %2 = arith.addf %0, %1 : vector<4x512xf32>
    %cst_1 = arith.constant 0.000000e+00 : f32
    %cst_2 = arith.constant 6.000000e+00 : f32
    %3 = vector.broadcast %cst_1 : f32 to vector<4x512xf32>
    %4 = arith.maximumf %3, %2 : vector<4x512xf32>
    %5 = vector.broadcast %cst_2 : f32 to vector<4x512xf32>
    %6 = arith.minimumf %5, %4 : vector<4x512xf32>
    %cst_3 = arith.constant 0.166666672 : f32
    %7 = vector.broadcast %cst_3 : f32 to vector<4x512xf32>
    %8 = arith.mulf %6, %7 : vector<4x512xf32>
    %9 = arith.mulf %0, %8 : vector<4x512xf32>
    %c0_4 = arith.constant 0 : index
    %c0_5 = arith.constant 0 : index
    %10 = vector.load %arg2[%c0_4, %c0_5] : memref<4x512xf32, #tpu.memory_space<vmem>>, vector<4x512xf32>
    tpu.vector_store %arg2[%c0_4, %c0_5], %9 {strides = array<i32>} : memref<4x512xf32, #tpu.memory_space<vmem>>, vector<4x512xf32>,
    return
  }
  func.func @transform_0(%arg0: i32) -> (i32, i32) {
    %c0_i32 = arith.constant 0 : i32
    %c0_i32_0 = arith.constant 0 : i32
    return %arg0, %c0_i32 : i32, i32
  }
  func.func @transform_1(%arg0: i32) -> (i32, i32) {
    %c0_i32 = arith.constant 0 : i32
    %c0_i32_0 = arith.constant 0 : i32
    return %arg0, %c0_i32 : i32, i32
  }
}

</mosaic_0001>

<bundles_post_ra>
// kernel: tpu_custom_call.1
= control target key start
LH: loop header
LB: loop body
LE: loop exit
PB: predicated region body
PF: predicated region fallthrough
CT: control target
= control target key end

     0   :  { %6 = vsyncpa [#allocation3], 0  ;;  %s126_s0 = inlined_call_operand.hbm [shape: f32[4,512], index: 0, kind: input, shape index: {}]   ;;  %s127_s1 = inlined_call_operand.hbm [shape: f32[4,512], index: 1, kind: output, shape index: {}]  }
   0x1   :  { %7 = vsyncpa [#allocation4], 0  ;;  %s13_s8 = sshll.u32 %s126_s0, 4  ;;  %s108_s9 = smov [#allocation2]   ;;  %s14_s8 = int_to_ptr.hbm [resolvable:$true] %s13_s8 }
   0x2   :  { %s15_s10 = sshll.u32 %s108_s9, 4  ;;  %s16_s10 = int_to_ptr.vmem [resolvable:$true] %s15_s10 }
   0x3   :  { %18 = dma.hbm_to_vmem [thread:$0]  %s14_s8, 256, %s16_s10, [#allocation3]  }
   0x4   :  { %104 = dma.done.wait [#allocation3], 256  }
   0x5   :  { %105 = vsyncadd [#allocation3], 4294967040  ;;  %v23_v0 = vld [vmem:[#allocation2] sm:$0xff]  ;;  %v24_v1 = vld [vmem:[#allocation2 + $0x8] sm:$0xff]  ;;  %s109_s11 = smov [#allocation5]   ;;  %s44_s14 = sshll.u32 %s127_s1, 4  ;;  %s45_s14 = int_to_ptr.hbm [resolvable:$true] %s44_s14 }
   0x6   :  { %v25_v2 = vadd.f32 3.0, %v23_v0  ;;  %v26_v3 = vadd.f32 3.0, %v24_v1  ;;  %s42_s12 = sshll.u32 %s109_s11, 4  ;;  %s43_s12 = int_to_ptr.vmem [resolvable:$true] %s42_s12 }
   0x8   :  { %v27_v4 = vmax.f32 %v25_v2, 0.0  ;;  %v28_v5 = vmax.f32 %v26_v3, 0.0 }
   0xa   :  { %v29_v6 = vmin.f32 %v27_v4, 6.0  ;;  %v30_v7 = vmin.f32 %v28_v5, 6.0 }
   0xc   :  { %v31_v8 = vmul.f32 0.16666667, %v29_v6  ;;  %v32_v9 = vmul.f32 0.16666667, %v30_v7 }
   0xe   :  { %v33_v10 = vmul.f32 %v31_v8, %v23_v0  ;;  %v34_v11 = vmul.f32 %v32_v9, %v24_v1 }
  0x10   :  { %35 = vst [vmem:[#allocation5] sm:$0xff] %v33_v10 }
  0x11   :  { %36 = vst [vmem:[#allocation5 + $0x8] sm:$0xff] %v34_v11 }
  0x12   :  { %47 = dma.vmem_to_hbm [thread:$0]  %s43_s12, 256, %s45_s14, [#allocation4]  }
  0x13   :  { %106 = dma.done.wait [#allocation4], 256  }
  0x14   :  { %107 = vsyncadd [#allocation4], 4294967040 }
  0x15   :  { %52 = vsyncpa [#allocation3], 1 }
  0x16   :  { %53 = vsyncpa [#allocation4], 1 }

</bundles_post_ra>
